<compile_context>
chip_gen: v7x
topology: tpu7x:2x2x1
jax: 0.10.0
libtpu: 0.0.40
codegen_flags: <defaults>
</compile_context>

<pallas_src>
import functools

import jax
import jax.numpy as jnp
from jax import lax
from jax.experimental import pallas as pl
from jax.experimental.pallas import tpu as pltpu


def _pick_chunk_t(seq_len, target=16):
    """Largest divisor of seq_len that is <= target (bounded unroll factor)."""
    c = min(seq_len, target)
    while seq_len % c:
        c -= 1
    return c


def _res_rnn_layer_kernel(act0_hbm, w_ih_ref, b_ref, w_hh_ref,      # inputs
                          act_ref, hid_ref,                         # outputs
                          xh_ref, hbuf_ref, load_sem,               # scratch
                          *, bpad, nhid, chunk_t, n_chunks):
    """One grid step == one residual-RNN layer.

    act_ref: [T*bpad, nhid] resident output block (constant index_map, grid
    axis 'arbitrary').  Per layer:
        xh  = act @ W_ih + (b_ih + b_hh)     (per-chunk, off the serial chain)
        h_t = tanh(xh_t + h_{t-1} @ W_hh)    (sequential recurrence)
        act = act + h                        (residual, batched per chunk)
    """
    l = pl.program_id(0)
    chunk_rows = chunk_t * bpad
    wdt = w_ih_ref.dtype                        # matmul operand dtype (f32/bf16)

    # ---- layer 0 only: load in_linear activations (computed by XLA) ---------
    @pl.when(l == 0)
    def _():
        cp = pltpu.make_async_copy(act0_hbm, act_ref, load_sem)
        cp.start()
        cp.wait()

    def compute_xh(c, dst_base):
        """xh_ref[dst_base : dst_base+chunk_rows] = act[chunk c] @ W_ih + b."""
        src = pl.ds(pl.multiple_of(c * chunk_rows, chunk_rows), chunk_rows)
        dst = pl.ds(pl.multiple_of(dst_base, chunk_rows), chunk_rows)
        x = act_ref[src, :].astype(wdt)
        xh_ref[dst, :] = (jnp.dot(x, w_ih_ref[...],
                                  preferred_element_type=jnp.float32)
                          + b_ref[...])

    # Prime chunk 0 into slot 0.
    compute_xh(jnp.int32(0), jnp.int32(0))

    def chunk_body(c, h):
        slot = c & 1
        xh_base = slot * chunk_rows

        # Sequential recurrence, fully unrolled only within the chunk
        # (bounded unroll: chunk_t steps per basic block).
        for t in range(chunk_t):
            row = pl.multiple_of(xh_base + t * bpad, bpad)
            pre = (xh_ref[pl.ds(row, bpad), :]
                   + jnp.dot(h.astype(wdt), w_hh_ref[...],
                             preferred_element_type=jnp.float32))
            h = jnp.tanh(pre)
            hbuf_ref[t * bpad:(t + 1) * bpad, :] = h

        # Batched residual for the whole chunk (one act RMW, not chunk_t).
        rows = pl.ds(pl.multiple_of(c * chunk_rows, chunk_rows), chunk_rows)
        act_ref[rows, :] = act_ref[rows, :] + hbuf_ref[...]

        # Prefetch the next chunk's x @ W_ih into the other buffer half
        # (redundantly recomputes the final chunk once; kept out of a pl.when
        #  region so the scheduler can pull it into idle MXU slots).
        compute_xh(jnp.minimum(c + 1, n_chunks - 1), (1 - slot) * chunk_rows)
        return h

    h_last = lax.fori_loop(0, n_chunks, chunk_body,
                           jnp.zeros((bpad, nhid), jnp.float32))
    hid_ref[0] = h_last.astype(hid_ref.dtype)


def res_rnn_encode(x, params, *, nlayers, nhid,
                   weight_dtype=jnp.float32, chunk_t=None):
    """x: [B, T, ninp] f32.  Returns (out [B, T, ninp], hidden [L, B, nhid])."""
    B, T, ninp = x.shape
    bpad = max(8, ((B + 7) // 8) * 8)                  # sublane-aligned batch
    nhid_p = max(128, ((nhid + 127) // 128) * 128)     # lane-aligned hidden dim
    if chunk_t is None:
        chunk_t = _pick_chunk_t(T)
    n_chunks = T // chunk_t
    chunk_rows = chunk_t * bpad

    # ---- work XLA already does well stays outside the kernel ----------------
    emb = jnp.transpose(x, (1, 0, 2)).astype(jnp.float32)    # [T, B, ninp]
    if bpad != B:
        emb = jnp.pad(emb, ((0, 0), (0, bpad - B), (0, 0)))
    emb2d = emb.reshape(T * bpad, ninp)

    if ninp != nhid:                                   # in_linear only if needed
        act0 = emb2d @ params["w_in"] + params["b_in"]
    else:
        act0 = emb2d
    if nhid_p != nhid:
        act0 = jnp.pad(act0, ((0, 0), (0, nhid_p - nhid)))
    act0 = act0.astype(jnp.float32)

    # Per-layer weights: zero-pad features (exact), pre-sum recurrent biases,
    # optionally cast matmul operands to bf16 (accumulation stays f32).
    pad_w = lambda w: jnp.pad(w, ((0, 0), (0, nhid_p - nhid), (0, nhid_p - nhid)))
    w_ih = pad_w(params["w_ih"]).astype(weight_dtype)
    w_hh = pad_w(params["w_hh"]).astype(weight_dtype)
    b_sum = jnp.pad(params["b_ih"] + params["b_hh"],
                    ((0, 0), (0, 0), (0, nhid_p - nhid))).astype(jnp.float32)

    kernel = functools.partial(_res_rnn_layer_kernel, bpad=bpad, nhid=nhid_p,
                               chunk_t=chunk_t, n_chunks=n_chunks)

    wbytes = jnp.dtype(weight_dtype).itemsize
    vmem_est = (2 * T * bpad * nhid_p * 4              # resident act slab (x2 margin)
                + 2 * bpad * nhid_p * 4                # hidden block
                + 4 * nhid_p * nhid_p * wbytes         # w_ih + w_hh, double-buffered
                + 2 * nhid_p * 4                       # bias
                + 3 * chunk_rows * nhid_p * 4)         # xh double buffer + h buffer
    vmem_limit = int(min(max(vmem_est + (16 << 20), 32 << 20), 110 << 20))

    cost = pl.CostEstimate(
        flops=int(4 * nlayers * T * bpad * nhid_p * nhid_p),
        transcendentals=int(nlayers * T * bpad * nhid_p),
        bytes_accessed=int(2 * T * bpad * nhid_p * 4
                           + nlayers * (2 * nhid_p * nhid_p * wbytes + nhid_p * 4)
                           + nlayers * bpad * nhid_p * 4))

    act_out, hidden = pl.pallas_call(
        kernel,
        out_shape=(
            jax.ShapeDtypeStruct((T * bpad, nhid_p), jnp.float32),
            jax.ShapeDtypeStruct((nlayers, bpad, nhid_p), jnp.float32),
        ),
        grid_spec=pltpu.PrefetchScalarGridSpec(
            num_scalar_prefetch=0,
            grid=(nlayers,),
            in_specs=[
                pl.BlockSpec(memory_space=pl.ANY),                          # act0 (HBM)
                pl.BlockSpec((None, nhid_p, nhid_p), lambda l: (l, 0, 0)),  # w_ih[l]
                pl.BlockSpec((None, 1, nhid_p), lambda l: (l, 0, 0)),       # b_ih+b_hh[l]
                pl.BlockSpec((None, nhid_p, nhid_p), lambda l: (l, 0, 0)),  # w_hh[l]
            ],
            out_specs=[
                pl.BlockSpec((T * bpad, nhid_p), lambda l: (0, 0)),    # act slab, resident
                pl.BlockSpec((1, bpad, nhid_p), lambda l: (l, 0, 0)),  # hidden[l]
            ],
            scratch_shapes=[
                pltpu.VMEM((2 * chunk_rows, nhid_p), jnp.float32),     # xh 2-slot buffer
                pltpu.VMEM((chunk_rows, nhid_p), jnp.float32),         # per-chunk h
                pltpu.SemaphoreType.DMA(()),                           # layer-0 act load
            ],
        ),
        compiler_params=pltpu.CompilerParams(
            dimension_semantics=("arbitrary",),        # layers are sequential
            vmem_limit_bytes=vmem_limit),
        cost_estimate=cost,
    )(act0, w_ih, b_sum, w_hh)

    act_out = act_out[:, :nhid]
    if ninp != nhid:                                   # out_linear only if needed
        out2d = act_out @ params["w_out"] + params["b_out"]
    else:
        out2d = act_out
    out = out2d.reshape(T, bpad, -1)[:, :B, :]
    out = jnp.transpose(out, (1, 0, 2))                # back to [B, T, ninp]
    hidden = hidden[:, :B, :nhid]
    return out, hidden


def make_params(key, ninp, nhid, nlayers):
    """PyTorch-style uniform(-1/sqrt(fan), 1/sqrt(fan)) init; weights stored
    pre-transposed so the kernel / wrapper do x @ W."""
    ks = jax.random.split(key, 8)
    u = lambda k, shape, fan: jax.random.uniform(
        k, shape, jnp.float32, -1.0 / jnp.sqrt(fan), 1.0 / jnp.sqrt(fan))
    return {
        "w_in":  u(ks[0], (ninp, nhid), ninp),            # in_linear.weight^T
        "b_in":  u(ks[1], (1, nhid), ninp),
        "w_ih":  u(ks[2], (nlayers, nhid, nhid), nhid),   # weight_ih_l0^T per layer
        "b_ih":  u(ks[3], (nlayers, 1, nhid), nhid),
        "w_hh":  u(ks[4], (nlayers, nhid, nhid), nhid),   # weight_hh_l0^T per layer
        "b_hh":  u(ks[5], (nlayers, 1, nhid), nhid),
        "w_out": u(ks[6], (nhid, ninp), nhid),            # out_linear.weight^T
        "b_out": u(ks[7], (1, ninp), nhid),
    }


def ref_encode(x, params, *, nlayers, nhid):
    """Pure-JAX reference of the same forward pass (correctness check)."""
    emb = jnp.transpose(x, (1, 0, 2))                     # [T, B, ninp]
    T, B, ninp = emb.shape
    h = [jnp.zeros((B, nhid), jnp.float32) for _ in range(nlayers)]
    outs = []
    for t in range(T):
        cur = emb[t]
        if ninp != nhid:
            cur = cur @ params["w_in"] + params["b_in"][0]
        for l in range(nlayers):
            pre = (cur @ params["w_ih"][l] + params["b_ih"][l, 0]
                   + h[l] @ params["w_hh"][l] + params["b_hh"][l, 0])
            h[l] = jnp.tanh(pre)
            cur = h[l] + cur
        if ninp != nhid:
            cur = cur @ params["w_out"] + params["b_out"][0]
        outs.append(cur)
    out = jnp.transpose(jnp.stack(outs, 0), (1, 0, 2))
    return out, jnp.stack(h, 0)


if __name__ == "__main__":
    B, T, ninp, nhid, nlayers = 4, 8, 32, 64, 2
    key = jax.random.PRNGKey(0)
    kx, kp = jax.random.split(key)
    x = jax.random.normal(kx, (B, T, ninp), jnp.float32)
    params = make_params(kp, ninp, nhid, nlayers)

    out, hidden = res_rnn_encode(x, params, nlayers=nlayers, nhid=nhid)
    out = jax.block_until_ready(out)
    hidden = jax.block_until_ready(hidden)

    ref_out, ref_hid = ref_encode(x, params, nlayers=nlayers, nhid=nhid)
    assert out.shape == (B, T, ninp) and hidden.shape == (nlayers, B, nhid)
    assert jnp.allclose(out, ref_out, rtol=1e-4, atol=2e-4), \
        float(jnp.max(jnp.abs(out - ref_out)))
    assert jnp.allclose(hidden, ref_hid, rtol=1e-4, atol=2e-4), \
        float(jnp.max(jnp.abs(hidden - ref_hid)))

    # bf16-weight path (MXU-native on v6e/v7x): smoke test, f32 accumulation.
    out_bf, hid_bf = res_rnn_encode(x, params, nlayers=nlayers, nhid=nhid,
                                    weight_dtype=jnp.bfloat16)
    out_bf = jax.block_until_ready(out_bf)
    assert out_bf.shape == out.shape and bool(jnp.all(jnp.isfinite(out_bf)))

    print("KERNEL_OK")
</pallas_src>

<mosaic_0001>
module attributes {stable_mosaic.version = 11 : i64} {
  func.func @_res_rnn_layer_kernel(%arg0: i32, %arg1: memref<64x128xf32, #tpu.memory_space<any>>, %arg2: memref<1x128x128xf32, #tpu.memory_space<vmem>>, %arg3: memref<1x1x128xf32, #tpu.memory_space<vmem>>, %arg4: memref<1x128x128xf32, #tpu.memory_space<vmem>>, %arg5: memref<64x128xf32, #tpu.memory_space<vmem>>, %arg6: memref<1x8x128xf32, #tpu.memory_space<vmem>>, %arg7: memref<128x128xf32, #tpu.memory_space<vmem>>, %arg8: memref<64x128xf32, #tpu.memory_space<vmem>>, %arg9: memref<!tpu.dma_semaphore, #tpu.memory_space<semaphore_mem>>) attributes {dimension_semantics = [#tpu.dimension_semantics<arbitrary>], iteration_bounds = array<i64: 2>, scalar_prefetch = 0 : i64, scratch_operands = 3 : i64, tpu.core_type = #tpu.core_type<tc>, window_params = [{}, {transform_indices = @transform_1, window_bounds = array<i64: 1, 128, 128>}, {transform_indices = @transform_2, window_bounds = array<i64: 1, 1, 128>}, {transform_indices = @transform_3, window_bounds = array<i64: 1, 128, 128>}, {pipeline_mode = #tpu.pipeline_mode<synchronous>, transform_indices = @transform_4, window_bounds = array<i64: 64, 128>}, {transform_indices = @transform_5, window_bounds = array<i64: 1, 8, 128>}]} {
    %c0_i32 = arith.constant 0 : i32
    %0 = arith.cmpi eq, %arg0, %c0_i32 : i32
    %1 = arith.extui %0 : i1 to i32
    %c0_i32_0 = arith.constant 0 : i32
    %2 = arith.cmpi ne, %1, %c0_i32_0 : i32
    scf.if %2 {
      tpu.enqueue_dma source(%arg1 : memref<64x128xf32, #tpu.memory_space<any>>) target(%arg5 : memref<64x128xf32, #tpu.memory_space<vmem>>) target_semaphore(%arg9 : memref<!tpu.dma_semaphore, #tpu.memory_space<semaphore_mem>>)
      tpu.wait_dma2 semaphore(%arg9 : memref<!tpu.dma_semaphore, #tpu.memory_space<semaphore_mem>>) src(%arg1 : memref<64x128xf32, #tpu.memory_space<any>>) dst(%arg5 : memref<64x128xf32, #tpu.memory_space<vmem>>)
    } else {
    }
    %c0_i32_1 = arith.constant 0 : i32
    %c64_i32 = arith.constant 64 : i32
    %3 = arith.muli %c0_i32_1, %c64_i32 : i32
    %4 = tpu.assume_multiple %3, 64 : i32
    %c0_i32_2 = arith.constant 0 : i32
    %5 = tpu.assume_multiple %c0_i32_2, 64 : i32
    %6 = arith.index_cast %4 : i32 to index
    %c0 = arith.constant 0 : index
    %7 = vector.load %arg5[%6, %c0] : memref<64x128xf32, #tpu.memory_space<vmem>>, vector<64x128xf32>
    %c0_3 = arith.constant 0 : index
    %c0_4 = arith.constant 0 : index
    %c0_5 = arith.constant 0 : index
    %8 = vector.load %arg2[%c0_3, %c0_4, %c0_5] : memref<1x128x128xf32, #tpu.memory_space<vmem>>, vector<1x128x128xf32>
    %9 = vector.shape_cast %8 : vector<1x128x128xf32> to vector<128x128xf32>
    %cst = arith.constant dense<0.000000e+00> : vector<64x128xf32>
    %10 = tpu.matmul %7, %9, %cst {dimension_numbers = #tpu.dot_dimension_numbers<[1], [0], [0], [1], [0, 0, 1, 1], [], []>} : vector<64x128xf32>, vector<128x128xf32>, vector<64x128xf32> -> vector<64x128xf32>
    %c0_6 = arith.constant 0 : index
    %c0_7 = arith.constant 0 : index
    %c0_8 = arith.constant 0 : index
    %11 = vector.load %arg3[%c0_6, %c0_7, %c0_8] : memref<1x1x128xf32, #tpu.memory_space<vmem>>, vector<1x1x128xf32>
    %12 = vector.shape_cast %11 : vector<1x1x128xf32> to vector<1x128xf32>
    %13 = vector.broadcast %12 : vector<1x128xf32> to vector<64x128xf32>
    %14 = arith.addf %10, %13 : vector<64x128xf32>
    %15 = arith.index_cast %5 : i32 to index
    %c0_9 = arith.constant 0 : index
    %16 = vector.load %arg7[%15, %c0_9] : memref<128x128xf32, #tpu.memory_space<vmem>>, vector<64x128xf32>
    tpu.vector_store %arg7[%15, %c0_9], %14 {strides = array<i32>} : memref<128x128xf32, #tpu.memory_space<vmem>>, vector<64x128xf32>,
    %cst_10 = arith.constant 0.000000e+00 : f32
    %17 = vector.broadcast %cst_10 : f32 to vector<8x128xf32>
    %c0_i32_11 = arith.constant 0 : i32
    %c1_i32 = arith.constant 1 : i32
    %18 = arith.andi %c0_i32_11, %c1_i32 : i32
    %c64_i32_12 = arith.constant 64 : i32
    %19 = arith.muli %18, %c64_i32_12 : i32
    %c0_i32_13 = arith.constant 0 : i32
    %20 = arith.addi %19, %c0_i32_13 : i32
    %21 = tpu.assume_multiple %20, 8 : i32
    %22 = arith.index_cast %21 : i32 to index
    %c0_14 = arith.constant 0 : index
    %23 = vector.load %arg7[%22, %c0_14] : memref<128x128xf32, #tpu.memory_space<vmem>>, vector<8x128xf32>
    %c0_15 = arith.constant 0 : index
    %c0_16 = arith.constant 0 : index
    %c0_17 = arith.constant 0 : index
    %24 = vector.load %arg4[%c0_15, %c0_16, %c0_17] : memref<1x128x128xf32, #tpu.memory_space<vmem>>, vector<1x128x128xf32>
    %25 = vector.shape_cast %24 : vector<1x128x128xf32> to vector<128x128xf32>
    %cst_18 = arith.constant dense<0.000000e+00> : vector<8x128xf32>
    %26 = tpu.matmul %17, %25, %cst_18 {dimension_numbers = #tpu.dot_dimension_numbers<[1], [0], [0], [1], [0, 0, 1, 1], [], []>} : vector<8x128xf32>, vector<128x128xf32>, vector<8x128xf32> -> vector<8x128xf32>
    %27 = arith.addf %23, %26 : vector<8x128xf32>
    %28 = math.tanh %27 : vector<8x128xf32>
    %c0_19 = arith.constant 0 : index
    %c0_20 = arith.constant 0 : index
    %29 = vector.load %arg8[%c0_19, %c0_20] : memref<64x128xf32, #tpu.memory_space<vmem>>, vector<8x128xf32>
    tpu.vector_store %arg8[%c0_19, %c0_20], %28 {strides = array<i32>} : memref<64x128xf32, #tpu.memory_space<vmem>>, vector<8x128xf32>,
    %c8_i32 = arith.constant 8 : i32
    %30 = arith.addi %19, %c8_i32 : i32
    %31 = tpu.assume_multiple %30, 8 : i32
    %32 = arith.index_cast %31 : i32 to index
    %c0_21 = arith.constant 0 : index
    %33 = vector.load %arg7[%32, %c0_21] : memref<128x128xf32, #tpu.memory_space<vmem>>, vector<8x128xf32>
    %c0_22 = arith.constant 0 : index
    %c0_23 = arith.constant 0 : index
    %c0_24 = arith.constant 0 : index
    %34 = vector.load %arg4[%c0_22, %c0_23, %c0_24] : memref<1x128x128xf32, #tpu.memory_space<vmem>>, vector<1x128x128xf32>
    %35 = vector.shape_cast %34 : vector<1x128x128xf32> to vector<128x128xf32>
    %cst_25 = arith.constant dense<0.000000e+00> : vector<8x128xf32>
    %36 = tpu.matmul %28, %35, %cst_25 {dimension_numbers = #tpu.dot_dimension_numbers<[1], [0], [0], [1], [0, 0, 1, 1], [], []>} : vector<8x128xf32>, vector<128x128xf32>, vector<8x128xf32> -> vector<8x128xf32>
    %37 = arith.addf %33, %36 : vector<8x128xf32>
    %38 = math.tanh %37 : vector<8x128xf32>
    %c8 = arith.constant 8 : index
    %c0_26 = arith.constant 0 : index
    %39 = vector.load %arg8[%c8, %c0_26] : memref<64x128xf32, #tpu.memory_space<vmem>>, vector<8x128xf32>
    tpu.vector_store %arg8[%c8, %c0_26], %38 {strides = array<i32>} : memref<64x128xf32, #tpu.memory_space<vmem>>, vector<8x128xf32>,
    %c16_i32 = arith.constant 16 : i32
    %40 = arith.addi %19, %c16_i32 : i32
    %41 = tpu.assume_multiple %40, 8 : i32
    %42 = arith.index_cast %41 : i32 to index
    %c0_27 = arith.constant 0 : index
    %43 = vector.load %arg7[%42, %c0_27] : memref<128x128xf32, #tpu.memory_space<vmem>>, vector<8x128xf32>
    %c0_28 = arith.constant 0 : index
    %c0_29 = arith.constant 0 : index
    %c0_30 = arith.constant 0 : index
    %44 = vector.load %arg4[%c0_28, %c0_29, %c0_30] : memref<1x128x128xf32, #tpu.memory_space<vmem>>, vector<1x128x128xf32>
    %45 = vector.shape_cast %44 : vector<1x128x128xf32> to vector<128x128xf32>
    %cst_31 = arith.constant dense<0.000000e+00> : vector<8x128xf32>
    %46 = tpu.matmul %38, %45, %cst_31 {dimension_numbers = #tpu.dot_dimension_numbers<[1], [0], [0], [1], [0, 0, 1, 1], [], []>} : vector<8x128xf32>, vector<128x128xf32>, vector<8x128xf32> -> vector<8x128xf32>
    %47 = arith.addf %43, %46 : vector<8x128xf32>
    %48 = math.tanh %47 : vector<8x128xf32>
    %c16 = arith.constant 16 : index
    %c0_32 = arith.constant 0 : index
    %49 = vector.load %arg8[%c16, %c0_32] : memref<64x128xf32, #tpu.memory_space<vmem>>, vector<8x128xf32>
    tpu.vector_store %arg8[%c16, %c0_32], %48 {strides = array<i32>} : memref<64x128xf32, #tpu.memory_space<vmem>>, vector<8x128xf32>,
    %c24_i32 = arith.constant 24 : i32
    %50 = arith.addi %19, %c24_i32 : i32
    %51 = tpu.assume_multiple %50, 8 : i32
    %52 = arith.index_cast %51 : i32 to index
    %c0_33 = arith.constant 0 : index
    %53 = vector.load %arg7[%52, %c0_33] : memref<128x128xf32, #tpu.memory_space<vmem>>, vector<8x128xf32>
    %c0_34 = arith.constant 0 : index
    %c0_35 = arith.constant 0 : index
    %c0_36 = arith.constant 0 : index
    %54 = vector.load %arg4[%c0_34, %c0_35, %c0_36] : memref<1x128x128xf32, #tpu.memory_space<vmem>>, vector<1x128x128xf32>
    %55 = vector.shape_cast %54 : vector<1x128x128xf32> to vector<128x128xf32>
    %cst_37 = arith.constant dense<0.000000e+00> : vector<8x128xf32>
    %56 = tpu.matmul %48, %55, %cst_37 {dimension_numbers = #tpu.dot_dimension_numbers<[1], [0], [0], [1], [0, 0, 1, 1], [], []>} : vector<8x128xf32>, vector<128x128xf32>, vector<8x128xf32> -> vector<8x128xf32>
    %57 = arith.addf %53, %56 : vector<8x128xf32>
    %58 = math.tanh %57 : vector<8x128xf32>
    %c24 = arith.constant 24 : index
    %c0_38 = arith.constant 0 : index
    %59 = vector.load %arg8[%c24, %c0_38] : memref<64x128xf32, #tpu.memory_space<vmem>>, vector<8x128xf32>
    tpu.vector_store %arg8[%c24, %c0_38], %58 {strides = array<i32>} : memref<64x128xf32, #tpu.memory_space<vmem>>, vector<8x128xf32>,
    %c32_i32 = arith.constant 32 : i32
    %60 = arith.addi %19, %c32_i32 : i32
    %61 = tpu.assume_multiple %60, 8 : i32
    %62 = arith.index_cast %61 : i32 to index
    %c0_39 = arith.constant 0 : index
    %63 = vector.load %arg7[%62, %c0_39] : memref<128x128xf32, #tpu.memory_space<vmem>>, vector<8x128xf32>
    %c0_40 = arith.constant 0 : index
    %c0_41 = arith.constant 0 : index
    %c0_42 = arith.constant 0 : index
    %64 = vector.load %arg4[%c0_40, %c0_41, %c0_42] : memref<1x128x128xf32, #tpu.memory_space<vmem>>, vector<1x128x128xf32>
    %65 = vector.shape_cast %64 : vector<1x128x128xf32> to vector<128x128xf32>
    %cst_43 = arith.constant dense<0.000000e+00> : vector<8x128xf32>
    %66 = tpu.matmul %58, %65, %cst_43 {dimension_numbers = #tpu.dot_dimension_numbers<[1], [0], [0], [1], [0, 0, 1, 1], [], []>} : vector<8x128xf32>, vector<128x128xf32>, vector<8x128xf32> -> vector<8x128xf32>
    %67 = arith.addf %63, %66 : vector<8x128xf32>
    %68 = math.tanh %67 : vector<8x128xf32>
    %c32 = arith.constant 32 : index
    %c0_44 = arith.constant 0 : index
    %69 = vector.load %arg8[%c32, %c0_44] : memref<64x128xf32, #tpu.memory_space<vmem>>, vector<8x128xf32>
    tpu.vector_store %arg8[%c32, %c0_44], %68 {strides = array<i32>} : memref<64x128xf32, #tpu.memory_space<vmem>>, vector<8x128xf32>,
    %c40_i32 = arith.constant 40 : i32
    %70 = arith.addi %19, %c40_i32 : i32
    %71 = tpu.assume_multiple %70, 8 : i32
    %72 = arith.index_cast %71 : i32 to index
    %c0_45 = arith.constant 0 : index
    %73 = vector.load %arg7[%72, %c0_45] : memref<128x128xf32, #tpu.memory_space<vmem>>, vector<8x128xf32>
    %c0_46 = arith.constant 0 : index
    %c0_47 = arith.constant 0 : index
    %c0_48 = arith.constant 0 : index
    %74 = vector.load %arg4[%c0_46, %c0_47, %c0_48] : memref<1x128x128xf32, #tpu.memory_space<vmem>>, vector<1x128x128xf32>
    %75 = vector.shape_cast %74 : vector<1x128x128xf32> to vector<128x128xf32>
    %cst_49 = arith.constant dense<0.000000e+00> : vector<8x128xf32>
    %76 = tpu.matmul %68, %75, %cst_49 {dimension_numbers = #tpu.dot_dimension_numbers<[1], [0], [0], [1], [0, 0, 1, 1], [], []>} : vector<8x128xf32>, vector<128x128xf32>, vector<8x128xf32> -> vector<8x128xf32>
    %77 = arith.addf %73, %76 : vector<8x128xf32>
    %78 = math.tanh %77 : vector<8x128xf32>
    %c40 = arith.constant 40 : index
    %c0_50 = arith.constant 0 : index
    %79 = vector.load %arg8[%c40, %c0_50] : memref<64x128xf32, #tpu.memory_space<vmem>>, vector<8x128xf32>
    tpu.vector_store %arg8[%c40, %c0_50], %78 {strides = array<i32>} : memref<64x128xf32, #tpu.memory_space<vmem>>, vector<8x128xf32>,
    %c48_i32 = arith.constant 48 : i32
    %80 = arith.addi %19, %c48_i32 : i32
    %81 = tpu.assume_multiple %80, 8 : i32
    %82 = arith.index_cast %81 : i32 to index
    %c0_51 = arith.constant 0 : index
    %83 = vector.load %arg7[%82, %c0_51] : memref<128x128xf32, #tpu.memory_space<vmem>>, vector<8x128xf32>
    %c0_52 = arith.constant 0 : index
    %c0_53 = arith.constant 0 : index
    %c0_54 = arith.constant 0 : index
    %84 = vector.load %arg4[%c0_52, %c0_53, %c0_54] : memref<1x128x128xf32, #tpu.memory_space<vmem>>, vector<1x128x128xf32>
    %85 = vector.shape_cast %84 : vector<1x128x128xf32> to vector<128x128xf32>
    %cst_55 = arith.constant dense<0.000000e+00> : vector<8x128xf32>
    %86 = tpu.matmul %78, %85, %cst_55 {dimension_numbers = #tpu.dot_dimension_numbers<[1], [0], [0], [1], [0, 0, 1, 1], [], []>} : vector<8x128xf32>, vector<128x128xf32>, vector<8x128xf32> -> vector<8x128xf32>
    %87 = arith.addf %83, %86 : vector<8x128xf32>
    %88 = math.tanh %87 : vector<8x128xf32>
    %c48 = arith.constant 48 : index
    %c0_56 = arith.constant 0 : index
    %89 = vector.load %arg8[%c48, %c0_56] : memref<64x128xf32, #tpu.memory_space<vmem>>, vector<8x128xf32>
    tpu.vector_store %arg8[%c48, %c0_56], %88 {strides = array<i32>} : memref<64x128xf32, #tpu.memory_space<vmem>>, vector<8x128xf32>,
    %c56_i32 = arith.constant 56 : i32
    %90 = arith.addi %19, %c56_i32 : i32
    %91 = tpu.assume_multiple %90, 8 : i32
    %92 = arith.index_cast %91 : i32 to index
    %c0_57 = arith.constant 0 : index
    %93 = vector.load %arg7[%92, %c0_57] : memref<128x128xf32, #tpu.memory_space<vmem>>, vector<8x128xf32>
    %c0_58 = arith.constant 0 : index
    %c0_59 = arith.constant 0 : index
    %c0_60 = arith.constant 0 : index
    %94 = vector.load %arg4[%c0_58, %c0_59, %c0_60] : memref<1x128x128xf32, #tpu.memory_space<vmem>>, vector<1x128x128xf32>
    %95 = vector.shape_cast %94 : vector<1x128x128xf32> to vector<128x128xf32>
    %cst_61 = arith.constant dense<0.000000e+00> : vector<8x128xf32>
    %96 = tpu.matmul %88, %95, %cst_61 {dimension_numbers = #tpu.dot_dimension_numbers<[1], [0], [0], [1], [0, 0, 1, 1], [], []>} : vector<8x128xf32>, vector<128x128xf32>, vector<8x128xf32> -> vector<8x128xf32>
    %97 = arith.addf %93, %96 : vector<8x128xf32>
    %98 = math.tanh %97 : vector<8x128xf32>
    %c56 = arith.constant 56 : index
    %c0_62 = arith.constant 0 : index
    %99 = vector.load %arg8[%c56, %c0_62] : memref<64x128xf32, #tpu.memory_space<vmem>>, vector<8x128xf32>
    tpu.vector_store %arg8[%c56, %c0_62], %98 {strides = array<i32>} : memref<64x128xf32, #tpu.memory_space<vmem>>, vector<8x128xf32>,
    %c64_i32_63 = arith.constant 64 : i32
    %100 = arith.muli %c0_i32_11, %c64_i32_63 : i32
    %101 = tpu.assume_multiple %100, 64 : i32
    %102 = arith.index_cast %101 : i32 to index
    %c0_64 = arith.constant 0 : index
    %103 = vector.load %arg5[%102, %c0_64] : memref<64x128xf32, #tpu.memory_space<vmem>>, vector<64x128xf32>
    %c0_65 = arith.constant 0 : index
    %c0_66 = arith.constant 0 : index
    %104 = vector.load %arg8[%c0_65, %c0_66] : memref<64x128xf32, #tpu.memory_space<vmem>>, vector<64x128xf32>
    %105 = arith.addf %103, %104 : vector<64x128xf32>
    %106 = arith.index_cast %101 : i32 to index
    %c0_67 = arith.constant 0 : index
    %107 = vector.load %arg5[%106, %c0_67] : memref<64x128xf32, #tpu.memory_space<vmem>>, vector<64x128xf32>
    tpu.vector_store %arg5[%106, %c0_67], %105 {strides = array<i32>} : memref<64x128xf32, #tpu.memory_space<vmem>>, vector<64x128xf32>,
    %c1_i32_68 = arith.constant 1 : i32
    %108 = arith.addi %c0_i32_11, %c1_i32_68 : i32
    %c0_i32_69 = arith.constant 0 : i32
    %109 = arith.minsi %108, %c0_i32_69 : i32
    %c1_i32_70 = arith.constant 1 : i32
    %110 = arith.subi %c1_i32_70, %18 : i32
    %c64_i32_71 = arith.constant 64 : i32
    %111 = arith.muli %110, %c64_i32_71 : i32
    %c64_i32_72 = arith.constant 64 : i32
    %112 = arith.muli %109, %c64_i32_72 : i32
    %113 = tpu.assume_multiple %112, 64 : i32
    %114 = tpu.assume_multiple %111, 64 : i32
    %115 = arith.index_cast %113 : i32 to index
    %c0_73 = arith.constant 0 : index
    %116 = vector.load %arg5[%115, %c0_73] : memref<64x128xf32, #tpu.memory_space<vmem>>, vector<64x128xf32>
    %c0_74 = arith.constant 0 : index
    %c0_75 = arith.constant 0 : index
    %c0_76 = arith.constant 0 : index
    %117 = vector.load %arg2[%c0_74, %c0_75, %c0_76] : memref<1x128x128xf32, #tpu.memory_space<vmem>>, vector<1x128x128xf32>
    %118 = vector.shape_cast %117 : vector<1x128x128xf32> to vector<128x128xf32>
    %cst_77 = arith.constant dense<0.000000e+00> : vector<64x128xf32>
    %119 = tpu.matmul %116, %118, %cst_77 {dimension_numbers = #tpu.dot_dimension_numbers<[1], [0], [0], [1], [0, 0, 1, 1], [], []>} : vector<64x128xf32>, vector<128x128xf32>, vector<64x128xf32> -> vector<64x128xf32>
    %c0_78 = arith.constant 0 : index
    %c0_79 = arith.constant 0 : index
    %c0_80 = arith.constant 0 : index
    %120 = vector.load %arg3[%c0_78, %c0_79, %c0_80] : memref<1x1x128xf32, #tpu.memory_space<vmem>>, vector<1x1x128xf32>
    %121 = vector.shape_cast %120 : vector<1x1x128xf32> to vector<1x128xf32>
    %122 = vector.broadcast %121 : vector<1x128xf32> to vector<64x128xf32>
    %123 = arith.addf %119, %122 : vector<64x128xf32>
    %124 = arith.index_cast %114 : i32 to index
    %c0_81 = arith.constant 0 : index
    %125 = vector.load %arg7[%124, %c0_81] : memref<128x128xf32, #tpu.memory_space<vmem>>, vector<64x128xf32>
    tpu.vector_store %arg7[%124, %c0_81], %123 {strides = array<i32>} : memref<128x128xf32, #tpu.memory_space<vmem>>, vector<64x128xf32>,
    %c1_i32_82 = arith.constant 1 : i32
    %c0_83 = arith.constant 0 : index
    %c0_84 = arith.constant 0 : index
    %c0_85 = arith.constant 0 : index
    %126 = vector.load %arg6[%c0_83, %c0_84, %c0_85] : memref<1x8x128xf32, #tpu.memory_space<vmem>>, vector<1x8x128xf32>
    %127 = vector.shape_cast %126 : vector<1x8x128xf32> to vector<8x128xf32>
    %128 = vector.shape_cast %98 : vector<8x128xf32> to vector<1x8x128xf32>
    tpu.vector_store %arg6[%c0_83, %c0_84, %c0_85], %128 {strides = array<i32>} : memref<1x8x128xf32, #tpu.memory_space<vmem>>, vector<1x8x128xf32>,
    return
  }
  func.func @transform_1(%arg0: i32) -> (i32, i32, i32) {
    %c0_i32 = arith.constant 0 : i32
    %c0_i32_0 = arith.constant 0 : i32
    %c0_i32_1 = arith.constant 0 : i32
    return %arg0, %c0_i32, %c0_i32_0 : i32, i32, i32
  }
  func.func @transform_2(%arg0: i32) -> (i32, i32, i32) {
    %c0_i32 = arith.constant 0 : i32
    %c0_i32_0 = arith.constant 0 : i32
    %c0_i32_1 = arith.constant 0 : i32
    return %arg0, %c0_i32, %c0_i32_0 : i32, i32, i32
  }
  func.func @transform_3(%arg0: i32) -> (i32, i32, i32) {
    %c0_i32 = arith.constant 0 : i32
    %c0_i32_0 = arith.constant 0 : i32
    %c0_i32_1 = arith.constant 0 : i32
    return %arg0, %c0_i32, %c0_i32_0 : i32, i32, i32
  }
  func.func @transform_4(%arg0: i32) -> (i32, i32) {
    %c0_i32 = arith.constant 0 : i32
    %c0_i32_0 = arith.constant 0 : i32
    %c0_i32_1 = arith.constant 0 : i32
    return %c0_i32, %c0_i32_0 : i32, i32
  }
  func.func @transform_5(%arg0: i32) -> (i32, i32, i32) {
    %c0_i32 = arith.constant 0 : i32
    %c0_i32_0 = arith.constant 0 : i32
    %c0_i32_1 = arith.constant 0 : i32
    return %arg0, %c0_i32, %c0_i32_0 : i32, i32, i32
  }
}

</mosaic_0001>

<bundles_post_ra>
// kernel: tpu_custom_call.1
= control target key start
LH: loop header
LB: loop body
LE: loop exit
PB: predicated region body
PF: predicated region fallthrough
CT: control target
= control target key end

     0   :  { %s3259_s0 = inlined_call_operand.hbm [shape: f32[64,128], index: 0, kind: input, shape index: {}]   ;;  %s3260_s1 = inlined_call_operand.hbm [shape: f32[2,128,128], index: 1, kind: input, shape index: {}]   ;;  %s3261_s2 = inlined_call_operand.vmem [shape: f32[2,1,128], index: 2, kind: input, shape index: {}]   ;;  %s3262_s3 = inlined_call_operand.hbm [shape: f32[2,128,128], index: 3, kind: input, shape index: {}]   ;;  %s3263_s4 = inlined_call_operand.hbm [shape: f32[64,128], index: 4, kind: output, shape index: {0}]   ;;  %s3264_s5 = inlined_call_operand.hbm [shape: f32[2,8,128], index: 5, kind: output, shape index: {1}]  }
   0x1   :  { %3270 = sst [smem:[#allocation22_spill]] %s3260_s1 }
   0x2   :  { %11 = vsyncpa [#allocation6], 0 }
   0x3   :  { %13 = vsyncpa [#allocation6 + $0x1], 0 }
   0x4   :  { %14 = vsyncpa [#allocation9], 0 }
   0x5   :  { %16 = vsyncpa [#allocation9 + $0x1], 0 }
   0x6   :  { %17 = vsyncpa [#allocation7], 0 }
   0x7   :  { %18 = vsyncpa [#allocation12], 0 }
   0x8   :  { %20 = vsyncpa [#allocation12 + $0x1], 0  ;;  %s2636_s18 = smov 0   ;;  %s2638_s19 = smov 0  }
   0x9   :  { %s2640_s20 = smov 0   ;;  %s2642_s21 = smov 0  }
   0xa LB: > { %s2657_s22 = sadd.s32 4294967295, %s2593_s21   ;;  %s1485_s23 = sadd.s32 4294967294, %s2593_s21   ;;  %s2593_s21 = sphi %s2642_s21, %s3297_s21   ;;  %s2589_s20 = sphi %s2640_s20, %s3296_s20   ;;  %s2585_s19 = sphi %s2638_s19, %s3295_s19   ;;  %s2581_s18 = sphi %s2636_s18, %s3294_s18  }
   0xb   : > { %s2661_s24 = sadd.s32 1, %s2593_s21   ;;  %s33_s25 = sadd.s32 1, %s2589_s20 }
   0xc   : > { %s30_s26 = ssub.s32 %s2593_s21, %s2661_s24  ;;  %p40_p0 = scmp.ne.s32.totalorder %s2589_s20, %s2585_s19 }
   0xd   : > { %p31_p1 = scmp.eq.s32.totalorder %s30_s26, 0  ;;  %p41_p2 = scmp.eq.s32.totalorder %s2593_s21, 0 }
   0xe   : > { %p46_p3 = scmp.ne.s32.totalorder %s2585_s19, %s2581_s18  ;;  %p3266_p4 = scmp.eq.s32.totalorder %s2657_s22, 0 }
   0xf   : > { %s2673_s27 = scalar_select %p31_p1, %s2589_s20, %s33_s25  }
  0x10   : > { %p2675_p5 = por %p41_p2, %p40_p0  ;;  %p2681_p6 = por %p3266_p4, %p46_p3 }
  0x11   : > { %p3265_p7 = scmp.eq.s32.totalorder %s2657_s22, 1  ;;  %p149_p8 = scmp.eq.s32.totalorder %s1485_s23, 1 }
  0x12   : > { %s3272_s29 = scalar_select %p2681_p6, 1, 0 }
  0x13   : > { %p2342_p10 = scmp.lt.s32.totalorder %s2593_s21, 2  ;;  %p2690_p11 = por %p3265_p7, %p40_p0 }
  0x14   : > { %p2694_p12 = por %p149_p8, %p46_p3  ;;  %s2699_s7 = sand.u32 1, %s2589_s20  }
  0x15   : > { %s3273_s30 = scalar_select %p2690_p11, 1, 0 }
  0x16   : > { %s3274_s6 = scalar_select %p2694_p12, 1, 0 }
  0x17   : > { %s1508_s8 = sshll.u32 %s2593_s21, 11  ;;  %s1488_s9 = sshll.u32 %s2699_s7, 7 }
  0x18   : > { %s3275_s1 = sld [smem:[#allocation22_spill]]  ;;  %s173_s13 = scalar_lea.vmem [#allocation5], %s1488_s9 }
  0x19   : > { %s180_s14 = sshll.u32 %s173_s13, 4  ;;  %p2714_p13 = pnand %p2342_p10, %p2675_p5  ;;  %s2718_s14 = int_to_ptr.vmem [resolvable:$true] %s180_s14 }
  0x1a   : > { %s170_s16 = scalar_lea.sflag [#allocation6], %s2699_s7 }
  0x1b   : > { %p2405_p1 = pneg %p2714_p13 }
  0x1e   : > { %s2708_s12 = scalar_lea.hbm %s3275_s1, %s1508_s8  ;;  %s2408_s26 = scalar_lea.hbm %s3275_s1, 4096 }
  0x1f   : > { %s2403_s17 = scalar_lea.hbm %s2708_s12, 2048  ;;  %p2409_p5 = scmp.lt.u32.totalorder %s2708_s12, %s3275_s1 }
  0x20   : > { %p2404_p0 = scmp.ne.s32.totalorder %s2708_s12, %s2403_s17  ;;  %p2410_p8 = scmp.lt.u32.totalorder %s2408_s26, %s2403_s17 }
  0x21   : > { %p2412_p9 = scmp.lt.u32.totalorder %s2403_s17, %s2708_s12 }
  0x22   : > { %p2406_p2 = pnand %p2405_p1, %p2404_p0  ;;  %p2411_p10 = por %p2410_p8, %p2409_p5 }
  0x24   : > { %p2407_p3 = pneg %p2406_p2  ;;  %p2413_p7 = por %p2412_p9, %p2411_p10 }
  0x26   : > { %p2414_p4 = pnand %p2413_p7, %p2407_p3 }
  0x28   : > { %2417 = shalt.err (!%p2414_p4)
}
  0x29   : > { %s2418_s11 = scalar_lea.vmem %s2718_s14, 2048  ;;  %s2595_s13 = smov [#allocation5]  }
  0x2a   : > { %p2419_p0 = scmp.ne.s32.totalorder %s2718_s14, %s2418_s11  ;;  %s2423_s23 = sshll.u32 %s2595_s13, 4  ;;  %s2424_s23 = int_to_ptr.vmem [resolvable:$false] %s2423_s23 }
  0x2b   : > { %s2425_s25 = scalar_lea.vmem %s2424_s23, 4096  ;;  %p2426_p11 = scmp.lt.s32.totalorder %s2718_s14, %s2424_s23 }
  0x2c   : > { %p2421_p2 = pnand %p2419_p0, %p2405_p1  ;;  %p2427_p5 = scmp.lt.s32.totalorder %s2425_s25, %s2418_s11 }
  0x2e   : > { %p2422_p12 = pneg %p2421_p2  ;;  %p2428_p8 = por %p2427_p5, %p2426_p11 }
  0x30   : > { %p2429_p9 = pnand %p2428_p8, %p2422_p12 }
  0x32   : > { %2432 = shalt.err (!%p2429_p9)
}
  0x33   : > { %s3268_s17 = smov 128   ;;  %s2597_s26 = smov 8  }
  0x34   : > { %2334 = dma.hbm_to_vmem [thread:$0]  (!%p2714_p13), %s2708_s12, 2048, %s2718_s14, %s170_s16, %s3268_s17, %s3268_s17, %s2597_s26  }
  0x35   : > { %p1494_p4 = scmp.ge.s32.totalorder %s2593_s21, 1  ;;  %p215_p7 = scmp.lt.s32.totalorder %s2593_s21, 3 }
  0x36   : > { %s2762_s13 = scalar_lea.hbm %s3262_s3, %s1508_s8  ;;  %s200_s23 = scalar_lea.vmem [#allocation8], %s1488_s9 }
  0x37   : > { %p2753_p11 = pnand %p1494_p4, %p215_p7  ;;  %s207_s25 = sshll.u32 %s200_s23, 4  ;;  %s2766_s25 = int_to_ptr.vmem [resolvable:$true] %s207_s25 }
  0x38   : > { %s197_s12 = scalar_lea.sflag [#allocation9], %s2699_s7  ;;  %s2433_s14 = scalar_lea.hbm %s2762_s13, 2048 }
  0x39   : > { %p2434_p12 = scmp.ne.s32.totalorder %s2762_s13, %s2433_s14  ;;  %s2438_s8 = scalar_lea.hbm %s3262_s3, 4096 }
  0x3a   : > { %p2439_p0 = scmp.lt.u32.totalorder %s2762_s13, %s3262_s3  ;;  %p2440_p2 = scmp.lt.u32.totalorder %s2438_s8, %s2433_s14 }
  0x3b   : > { %p2436_p3 = pnand %p2434_p12, %p2405_p1  ;;  %p2442_p8 = scmp.lt.u32.totalorder %s2433_s14, %s2762_s13 }
  0x3c   : > { %p2441_p5 = por %p2440_p2, %p2439_p0 }
  0x3d   : > { %p2437_p10 = pneg %p2436_p3 }
  0x3e   : > { %p2443_p9 = por %p2442_p8, %p2441_p5 }
  0x40   : > { %p2444_p4 = pnand %p2443_p9, %p2437_p10 }
  0x42   : > { %2447 = shalt.err (!%p2444_p4)
}
  0x43   : > { %s2448_s9 = scalar_lea.vmem %s2766_s25, 2048  ;;  %s2598_s23 = smov [#allocation8]  }
  0x44   : > { %p2449_p7 = scmp.ne.s32.totalorder %s2766_s25, %s2448_s9  ;;  %s2453_s16 = sshll.u32 %s2598_s23, 4  ;;  %s2454_s16 = int_to_ptr.vmem [resolvable:$false] %s2453_s16 }
  0x45   : > { %s2455_s17 = scalar_lea.vmem %s2454_s16, 4096  ;;  %p2456_p6 = scmp.lt.s32.totalorder %s2766_s25, %s2454_s16 }
  0x46   : > { %p2451_p12 = pnand %p2449_p7, %p2405_p1  ;;  %p2457_p0 = scmp.lt.s32.totalorder %s2455_s17, %s2448_s9 }
  0x48   : > { %p2452_p3 = pneg %p2451_p12  ;;  %p2458_p2 = por %p2457_p0, %p2456_p6 }
  0x4a   : > { %p2459_p5 = pnand %p2458_p2, %p2452_p3 }
  0x4c   : > { %2462 = shalt.err (!%p2459_p5)
}
  0x4d   : > { %s3278_s14 = smov 128   ;;  %219 = sbr.rel (%p2753_p11) target bundleno = 2173 (0x87d), region = 32 }
  0x4e   : > { %2337 = dma.hbm_to_vmem [thread:$0]  (!%p2714_p13), %s2762_s13, 2048, %s2766_s25, %s197_s12, %s3278_s14, %s3278_s14, %s2597_s26  }
  0x4f   : > { %s2800_s10 = sand.u32 (!%p2753_p11), 1, %s2585_s19   ;;  %p3279_p6 = scmp.ne.s32.totalorder (!%p2753_p11), %s3272_s29, 0 }
  0x50   : > { %s1495_s8 = sshll.u32 (!%p2753_p11), %s2800_s10, 7  ;;  %s222_s11 = scalar_lea.sflag (!%p2753_p11), [#allocation6], %s2800_s10 }
  0x51   : > { %s2804_s15 = scalar_lea.vmem (!%p2753_p11), [#allocation5], %s1495_s8 }
  0x54   : > { %2560 = dma.done.wait (%p3279_p6), %s222_s11, 2048  }
  0x55   : > { %2562 = vsyncadd (%p3279_p6), %s222_s11, 4294965248  ;;  %s231_s7 = scalar_lea.sflag [#allocation9], %s2800_s10  ;;  %s2811_s26 = scalar_lea.vmem [#allocation8], %s1495_s8 }
  0x56   : > { %2564 = dma.done.wait (%p3279_p6), %s231_s7, 2048  }
  0x57   : > { %2566 = vsyncadd (%p3279_p6), %s231_s7, 4294965248  ;;  %s1497_s28 = sshll.u32 %s2800_s10, 3  ;;  %p267_p13 = scmp.lt.s32.totalorder %s2657_s22, 1 }
  0x58   : > { %s2599_s23 = smov [#allocation10]   ;;  %s2463_s14 = scalar_lea.hbm %s3259_s0, 1024 }
  0x59   : > { %s2820_s13 = scalar_select %p267_p13, %s2657_s22, 1 }
  0x5a   : > { %s281_s16 = sshll.u32 %s2599_s23, 4  ;;  %p2464_p1 = scmp.ne.s32.totalorder %s3259_s0, %s2463_s14  ;;  %s2826_s16 = int_to_ptr.vmem [resolvable:$true] %s281_s16 }
  0x5b   : > { %s269_s9 = scalar_lea.vmem %s3261_s2, %s2820_s13  ;;  %p3280_p11 = scmp.eq.s32.totalorder %s2657_s22, 0 }
  0x5c   : > { %p2469_p9 = scmp.lt.u32.totalorder %s2463_s14, %s3259_s0 }
  0x5d   : > { %p2465_p10 = pnand %p2464_p1, %p3280_p11 }
  0x5f   : > { %p2466_p8 = pneg %p2465_p10 }
  0x61   : > { %p2471_p4 = pnand %p2469_p9, %p2466_p8 }
  0x63   : > { %2474 = shalt.err (!%p2471_p4)  }
  0x64   : > { %s2840_s25 = scalar_lea.vmem %s2826_s16, 1024  ;;  %p3281_p12 = pmov %p3280_p11 }
  0x65   : > { %p2476_p7 = scmp.ne.s32.totalorder %s2826_s16, %s2840_s25  ;;  %p2482_p2 = scmp.lt.s32.totalorder %s2826_s16, %s2826_s16 }
  0x66   : > { %p2483_p5 = scmp.lt.s32.totalorder %s2840_s25, %s2840_s25 }
  0x67   : > { %p2477_p3 = pnand %p2476_p7, %p3281_p12 }
  0x68   : > { %p2853_p6 = por %p2483_p5, %p2482_p2 }
  0x69   : > { %p2478_p0 = pneg %p2477_p3 }
  0x6b   : > { %p2485_p13 = pnand %p2853_p6, %p2478_p0 }
  0x6d   : > { %2488 = shalt.err (!%p2485_p13)  }
  0x6e   : > { %p3283_p1 = pmov %p3280_p11  ;;  %s2865_s17 = scalar_lea.vmem [#allocation11], %s1497_s28 }
  0x70   : > { %2323 = dma.hbm_to_vmem [thread:$0]  (%p3283_p1), %s3259_s0, 1024, %s2826_s16, [#allocation4] }
  0x71   : > { %p3284_p11 = pmov %p3283_p1 }
  0x72   : > { %p3285_p10 = pmov %p3283_p1 }
  0x73   : > { %2568 = dma.done.wait (%p3284_p11), [#allocation4], 1024 }
  0x74   : > { %2570 = vsyncadd (%p3285_p10), [#allocation4], 4294966272  ;;  %v2600_v0 = vmov 0.0|0.0   ;;  %vm2601_vm0 = vmmov 0   ;;  %v2602_v1 = vmov 0.0   ;;  %v296_v2 = vld [vmem:[%s2804_s15] sm:$0xff] }
  0x75   : > { %2094 = vmatprep.subr.bf16.mxu1 %v2600_v0  ;;  %1770 = vmatprep.mubr.msk.f32.mxu1 %vm2601_vm0, %v2602_v1  ;;  %v297_v3 = vld [vmem:[%s2804_s15 + $0x8] sm:$0xff]  ;;  %v433_v4 = vld [vmem:[%s2811_s26] sm:$0xff]  ;;  %v298_v7 = vld [vmem:[%s2804_s15 + $0x10] sm:$0xff]  ;;  %s1503_s28 = sshll.u32 %s2657_s22, 7  ;;  %s1364_s13 = sshll.u32 %s2865_s17, 4  ;;  %s1365_s13 = int_to_ptr.vmem [resolvable:$true] %s1364_s13 }
  0x76   : > { %v2877_v5 = vpack.c.bf16 %v297_v3, %v296_v2  ;;  %v434_v6 = vld [vmem:[%s2811_s26 + $0x8] sm:$0xff]  ;;  %v299_v8 = vld [vmem:[%s2804_s15 + $0x18] sm:$0xff]  ;;  %v435_v11 = vld [vmem:[%s2811_s26 + $0x10] sm:$0xff]  ;;  %p3286_p8 = scmp.eq.s32.totalorder %s2657_s22, 1 }
  0x77   : > { %v2882_v9 = vpack.c.bf16 %v434_v6, %v433_v4  ;;  %v2884_v10 = vpack.c.bf16 %v299_v8, %v298_v7  ;;  %v436_v12 = vld [vmem:[%s2811_s26 + $0x18] sm:$0xff]  ;;  %v300_v13 = vld [vmem:[%s2804_s15 + $0x20] sm:$0xff]  ;;  %v301_v14 = vld [vmem:[%s2804_s15 + $0x28] sm:$0xff] }
  0x78   : > { %2063 = vmatprep.subr.bf16.mxu0 %v2877_v5  ;;  %v2893_v15 = vpack.c.bf16 %v436_v12, %v435_v11  ;;  %v2897_v16 = vpack.c.bf16 %v301_v14, %v300_v13  ;;  %v437_v17 = vld [vmem:[%s2811_s26 + $0x20] sm:$0xff]  ;;  %v438_v18 = vld [vmem:[%s2811_s26 + $0x28] sm:$0xff]  ;;  %v302_v19 = vld [vmem:[%s2804_s15 + $0x30] sm:$0xff]  ;;  %p2491_p9 = pnand %p2476_p7, %p3286_p8 }
  0x79   : > { %2065 = vmatpush3.bf16.msra.mxu0 %v2877_v5  ;;  %2096 = vmatpush3.bf16.msra.mxu1 %v2882_v9  ;;  %v303_v20 = vld [vmem:[%s2804_s15 + $0x38] sm:$0xff]  ;;  %v2905_v21 = vpack.c.bf16 %v438_v18, %v437_v17  ;;  %v439_v23 = vld [vmem:[%s2811_s26 + $0x30] sm:$0xff]  ;;  %v304_v25 = vld [vmem:[%s2804_s15 + $0x40] sm:$0xff] }
  0x7a   : > { %2067 = vmatprep.subr.bf16.mxu0 %v2884_v10  ;;  %2097 = vmatprep.subr.bf16.mxu1 %v2600_v0  ;;  %v2909_v22 = vpack.c.bf16 %v303_v20, %v302_v19  ;;  %v440_v24 = vld [vmem:[%s2811_s26 + $0x38] sm:$0xff]  ;;  %v305_v26 = vld [vmem:[%s2804_s15 + $0x48] sm:$0xff]  ;;  %v2915_v27 = vld [vmem:[#allocation10] sm:$0xff]  ;;  %p2492_p4 = pneg %p2491_p9 }
  0x7b   : > { %1726 = vmatprep.mubr.f32.mxu0 %v2915_v27  ;;  %v2920_v28 = vpack.c.bf16 %v440_v24, %v439_v23  ;;  %v2924_v29 = vpack.c.bf16 %v305_v26, %v304_v25  ;;  %v441_v30 = vld [vmem:[%s2811_s26 + $0x40] sm:$0xff]  ;;  %v442_v31 = vld [vmem:[%s2811_s26 + $0x48] sm:$0xff]  ;;  %v306_v32 = vld [vmem:[%s2804_s15 + $0x50] sm:$0xff] }
  0x7c   : > { %v307_v33 = vld [vmem:[%s2804_s15 + $0x58] sm:$0xff]  ;;  %v2932_v34 = vpack.c.bf16 %v442_v31, %v441_v30  ;;  %v443_v36 = vld [vmem:[%s2811_s26 + $0x50] sm:$0xff]  ;;  %v308_v38 = vld [vmem:[%s2804_s15 + $0x60] sm:$0xff]  ;;  %p2499_p12 = pnand %p2492_p4, %p2853_p6 }
  0x7d   : > { %2069 = vmatpush3.bf16.msra.mxu0 %v2884_v10  ;;  %2099 = vmatpush3.bf16.msra.mxu1 %v2893_v15  ;;  %v2936_v35 = vpack.c.bf16 %v307_v33, %v306_v32  ;;  %v444_v37 = vld [vmem:[%s2811_s26 + $0x58] sm:$0xff]  ;;  %v309_v39 = vld [vmem:[%s2804_s15 + $0x68] sm:$0xff]  ;;  %v445_v42 = vld [vmem:[%s2811_s26 + $0x60] sm:$0xff] }
  0x7e   : > { %2071 = vmatprep.subr.bf16.mxu0 %v2897_v16  ;;  %2100 = vmatprep.subr.bf16.mxu1 %v2600_v0  ;;  %v2944_v40 = vpack.c.bf16 %v444_v37, %v443_v36  ;;  %v2948_v41 = vpack.c.bf16 %v309_v39, %v308_v38  ;;  %v446_v43 = vld [vmem:[%s2811_s26 + $0x68] sm:$0xff]  ;;  %v310_v44 = vld [vmem:[%s2804_s15 + $0x70] sm:$0xff]  ;;  %v311_v45 = vld [vmem:[%s2804_s15 + $0x78] sm:$0xff] }
  0x7f   : > { %v2956_v46 = vpack.c.bf16 %v446_v43, %v445_v42  ;;  %v2960_v47 = vpack.c.bf16 %v311_v45, %v310_v44  ;;  %v447_v48 = vld [vmem:[%s2811_s26 + $0x70] sm:$0xff]  ;;  %v448_v49 = vld [vmem:[%s2811_s26 + $0x78] sm:$0xff]  ;;  %v2972_v51 = vld [vmem:[#allocation10 + $0x8] sm:$0xff] }
  0x80   : > { %v2966_v50 = vpack.c.bf16 %v448_v49, %v447_v48  ;;  %v3012_v52 = vld [vmem:[#allocation10 + $0x10] sm:$0xff]  ;;  %v3015_v53 = vld [vmem:[#allocation10 + $0x18] sm:$0xff]  ;;  %v3018_v54 = vld [vmem:[#allocation10 + $0x20] sm:$0xff] }
  0x81   : > { %2073 = vmatpush3.bf16.msra.mxu0 %v2897_v16  ;;  %2102 = vmatpush3.bf16.msra.mxu1 %v2905_v21  ;;  %v3021_v55 = vld [vmem:[#allocation10 + $0x28] sm:$0xff]  ;;  %v3024_v56 = vld [vmem:[#allocation10 + $0x30] sm:$0xff]  ;;  %v3027_v57 = vld [vmem:[#allocation10 + $0x38] sm:$0xff] }
  0x82   : > { %2075 = vmatprep.subr.bf16.mxu0 %v2909_v22  ;;  %2103 = vmatprep.subr.bf16.mxu1 %v2600_v0  ;;  %v3037_v58 = vld [vmem:[%s269_s9] ss:$0 sm:$0xff] }
  0x85   : > { %2077 = vmatpush3.bf16.msra.mxu0 %v2909_v22  ;;  %2105 = vmatpush3.bf16.msra.mxu1 %v2920_v28 }
  0x86   : > { %2079 = vmatprep.subr.bf16.mxu0 %v2924_v29  ;;  %2106 = vmatprep.subr.bf16.mxu1 %v2600_v0 }
  0x89   : > { %2081 = vmatpush3.bf16.msra.mxu0 %v2924_v29  ;;  %2108 = vmatpush3.bf16.msra.mxu1 %v2932_v34 }
  0x8a   : > { %2083 = vmatprep.subr.bf16.mxu0 %v2936_v35  ;;  %2109 = vmatprep.subr.bf16.mxu1 %v2600_v0 }
  0x8d   : > { %2085 = vmatpush3.bf16.msra.mxu0 %v2936_v35  ;;  %2111 = vmatpush3.bf16.msra.mxu1 %v2944_v40 }
  0x8e   : > { %2087 = vmatprep.subr.bf16.mxu0 %v2948_v41  ;;  %2112 = vmatprep.subr.bf16.mxu1 %v2600_v0 }
  0x91   : > { %2089 = vmatpush3.bf16.msra.mxu0 %v2948_v41  ;;  %2114 = vmatpush3.bf16.msra.mxu1 %v2956_v46 }
  0x92   : > { %2091 = vmatprep.subr.bf16.mxu0 %v2960_v47  ;;  %2115 = vmatprep.subr.bf16.mxu1 %v2600_v0 }
  0x95   : > { %2093 = vmatpush3.bf16.msra.mxu0 %v2960_v47  ;;  %2117 = vmatpush3.bf16.msra.mxu1 %v2966_v50 }
  0x96   : > { %2118 = vmatprep.subr.bf16.mxu0 %v2600_v0  ;;  %2142 = vmatprep.subr.bf16.mxu1 %v2600_v0 }
  0x98   : > { %1727 = vmatmul.mubr.f32.vlgmr.msra.gmra.mrb[0].mxu0 %v2972_v51  ;;  %1771 = vmatmul.mubr.f32.vlgmr.msra.gmra.mrb[0].mxu1 %v2602_v1 }
  0x99   : > { %2120 = vmatpush3.bf16.msra.mxu0 %v2882_v9  ;;  %2144 = vmatpush3.bf16.msra.mxu1 %v2882_v9 }
  0x9a   : > { %2121 = vmatprep.subr.bf16.mxu0 %v2600_v0  ;;  %2145 = vmatprep.subr.bf16.mxu1 %v2600_v0 }
  0x9b   : > { %1840 = vmatprep.mubr.msk.f32.mxu1 %vm2601_vm0, %v2602_v1  ;;  %1729 = vmatprep.mubr.f32.mxu0 %v3012_v52 }
  0x9c   : > { %1730 = vmatmul.mubr.f32.gmra.mrb[2].mxu0 %v3015_v53 }
  0x9d   : > { %2123 = vmatpush3.bf16.msra.mxu0 %v2893_v15  ;;  %2147 = vmatpush3.bf16.msra.mxu1 %v2893_v15 }
  0x9e   : > { %2124 = vmatprep.subr.bf16.mxu0 %v2600_v0  ;;  %2148 = vmatprep.subr.bf16.mxu1 %v2600_v0 }
  0x9f   : > { %1732 = vmatprep.mubr.f32.mxu0 %v3018_v54 }
  0xa0   : > { %1733 = vmatmul.mubr.f32.gmra.mrb[4].mxu0 %v3021_v55 }
  0xa1   : > { %2126 = vmatpush3.bf16.msra.mxu0 %v2905_v21  ;;  %2150 = vmatpush3.bf16.msra.mxu1 %v2905_v21 }
  0xa2   : > { %2127 = vmatprep.subr.bf16.mxu0 %v2600_v0  ;;  %2151 = vmatprep.subr.bf16.mxu1 %v2600_v0 }
  0xa3   : > { %1735 = vmatprep.mubr.f32.mxu0 %v3024_v56 }
  0xa4   : > { %1736 = vmatmul.mubr.f32.gmra.mrb[6].mxu0 %v3027_v57 }
  0xa5   : > { %2129 = vmatpush3.bf16.msra.mxu0 %v2920_v28  ;;  %2153 = vmatpush3.bf16.msra.mxu1 %v2920_v28 }
  0xa6   : > { %2130 = vmatprep.subr.bf16.mxu0 %v2600_v0  ;;  %2154 = vmatprep.subr.bf16.mxu1 %v2600_v0 }
  0xa7   : > { %1805 = vmatprep.mubr.msk.f32.mxu0 %vm2601_vm0, %v2602_v1 }
  0xa9   : > { %2132 = vmatpush3.bf16.msra.mxu0 %v2932_v34  ;;  %2156 = vmatpush3.bf16.msra.mxu1 %v2932_v34 }
  0xaa   : > { %2133 = vmatprep.subr.bf16.mxu0 %v2600_v0  ;;  %2157 = vmatprep.subr.bf16.mxu1 %v2600_v0 }
  0xad   : > { %2135 = vmatpush3.bf16.msra.mxu0 %v2944_v40  ;;  %2159 = vmatpush3.bf16.msra.mxu1 %v2944_v40 }
  0xae   : > { %2136 = vmatprep.subr.bf16.mxu0 %v2600_v0  ;;  %2160 = vmatprep.subr.bf16.mxu1 %v2600_v0 }
  0xb1   : > { %2138 = vmatpush3.bf16.msra.mxu0 %v2956_v46  ;;  %2162 = vmatpush3.bf16.msra.mxu1 %v2956_v46 }
  0xb2   : > { %2139 = vmatprep.subr.bf16.mxu0 %v2600_v0  ;;  %2163 = vmatprep.subr.bf16.mxu1 %v2600_v0 }
  0xb5   : > { %2141 = vmatpush3.bf16.msra.mxu0 %v2966_v50  ;;  %2165 = vmatpush3.bf16.msra.mxu1 %v2966_v50 }
  0xb6   : > { %2166 = vmatprep.subr.bf16.mxu0 %v2600_v0  ;;  %2190 = vmatprep.subr.bf16.mxu1 %v2600_v0 }
 0x16b   : > { %v1728_v59 = vpop.f32.mrb[0].mxu0  ;;  %v515_v60 = vpop.f32.mrb[0].mxu1 }
 0x16c   : > { %v385_v61 = vpop.f32.mrb[1].mxu0  ;;  %v1772_v62 = vpop.f32.mrb[1].mxu1  ;;  %v391_v14 = vadd.f32 %v1728_v59, %v3037_v58 }
 0x16d   : > { %v386_v63 = vadd.f32 %v3037_v58, %v385_v61 }
 0x16f   : > { %v519_v2 = vadd.f32 %v515_v60, %v386_v63  ;;  %v1731_v6 = vpop.f32.mrb[2].mxu0 }
 0x170   : > { %v395_v7 = vpop.f32.mrb[3].mxu0  ;;  %v401_v32 = vadd.f32 %v1731_v6, %v3037_v58 }
 0x171   : > { %2387 = vtanh.f32 %v519_v2  ;;  %v396_v24 = vadd.f32 %v3037_v58, %v395_v7 }
 0x173   : > { %v3062_v8 = vpop.f32.mrb[4].mxu0 }
 0x174   : > { %v3064_v11 = vpop.f32.mrb[5].mxu0 }
 0x175   : > { %v406_v42 = vadd.f32 %v3037_v58, %v3064_v11 }
 0x177   : > { %v3066_v12 = vpop.f32.mrb[6].mxu0 }
 0x178   : > { %v3068_v13 = vpop.f32.mrb[7].mxu0 }
 0x17b   : > { %v2388_v3 = vpop.eup %2387 }
 0x17c   : > { %v3041_v4 = vadd.f32 %v2388_v3, %v2915_v27  ;;  %1806 = vmatmul.mubr.f32.vlgmr.msra.gmra.mrb[8].mxu0 %v2388_v3 }
 0x17d   : > { %2168 = vmatpush3.bf16.msra.mxu0 %v2882_v9  ;;  %1875 = vmatprep.mubr.msk.f32.mxu0 %vm2601_vm0, %v2602_v1 }
 0x17e   : > { %1183 = vst [vmem:[#allocation10] sm:$0xff] %v3041_v4  ;;  %2169 = vmatprep.subr.bf16.mxu0 %v2600_v0 }
 0x181   : > { %2171 = vmatpush3.bf16.msra.mxu0 %v2893_v15 }
 0x182   : > { %2172 = vmatprep.subr.bf16.mxu0 %v2600_v0 }
 0x185   : > { %2174 = vmatpush3.bf16.msra.mxu0 %v2905_v21 }
 0x186   : > { %2175 = vmatprep.subr.bf16.mxu0 %v2600_v0 }
 0x189   : > { %2177 = vmatpush3.bf16.msra.mxu0 %v2920_v28 }
 0x18a   : > { %2178 = vmatprep.subr.bf16.mxu0 %v2600_v0 }
 0x18d   : > { %2180 = vmatpush3.bf16.msra.mxu0 %v2932_v34 }
 0x18e   : > { %2181 = vmatprep.subr.bf16.mxu0 %v2600_v0 }
 0x191   : > { %2183 = vmatpush3.bf16.msra.mxu0 %v2944_v40 }
 0x192   : > { %2184 = vmatprep.subr.bf16.mxu0 %v2600_v0 }
 0x195   : > { %2186 = vmatpush3.bf16.msra.mxu0 %v2956_v46 }
 0x196   : > { %2187 = vmatprep.subr.bf16.mxu0 %v2600_v0 }
 0x199   : > { %2189 = vmatpush3.bf16.msra.mxu0 %v2966_v50 }
 0x19a   : > { %2214 = vmatprep.subr.bf16.mxu0 %v2600_v0 }
 0x24f   : > { %v606_v17 = vpop.f32.mrb[8].mxu0 }
 0x250   : > { %v610_v18 = vadd.f32 %v606_v17, %v391_v14  ;;  %v1807_v19 = vpop.f32.mrb[9].mxu0 }
 0x252   : > { %2389 = vtanh.f32 %v610_v18 }
 0x25c   : > { %v2390_v20 = vpop.eup %2389 }
 0x25d   : > { %v3072_v23 = vadd.f32 %v2390_v20, %v2972_v51  ;;  %1841 = vmatmul.mubr.f32.vlgmr.msra.gmra.mrb[2].mxu1 %v2390_v20  ;;  %v421_v51 = vadd.f32 %v3066_v12, %v3037_v58 }
 0x25e   : > { %2192 = vmatpush3.bf16.msra.mxu1 %v2882_v9  ;;  %1910 = vmatprep.mubr.msk.f32.mxu1 %vm2601_vm0, %v2602_v1 }
 0x25f   : > { %1184 = vst [vmem:[#allocation10 + $0x8] sm:$0xff] %v3072_v23  ;;  %2193 = vmatprep.subr.bf16.mxu1 %v2600_v0 }
 0x262   : > { %2195 = vmatpush3.bf16.msra.mxu1 %v2893_v15 }
 0x263   : > { %2196 = vmatprep.subr.bf16.mxu1 %v2600_v0 }
 0x266   : > { %2198 = vmatpush3.bf16.msra.mxu1 %v2905_v21 }
 0x267   : > { %2199 = vmatprep.subr.bf16.mxu1 %v2600_v0 }
 0x26a   : > { %2201 = vmatpush3.bf16.msra.mxu1 %v2920_v28 }
 0x26b   : > { %2202 = vmatprep.subr.bf16.mxu1 %v2600_v0 }
 0x26e   : > { %2204 = vmatpush3.bf16.msra.mxu1 %v2932_v34 }
 0x26f   : > { %2205 = vmatprep.subr.bf16.mxu1 %v2600_v0 }
 0x272   : > { %2207 = vmatpush3.bf16.msra.mxu1 %v2944_v40 }
 0x273   : > { %2208 = vmatprep.subr.bf16.mxu1 %v2600_v0 }
 0x276   : > { %2210 = vmatpush3.bf16.msra.mxu1 %v2956_v46 }
 0x277   : > { %2211 = vmatprep.subr.bf16.mxu1 %v2600_v0 }
 0x27a   : > { %2213 = vmatpush3.bf16.msra.mxu1 %v2966_v50 }
 0x27b   : > { %2238 = vmatprep.subr.bf16.mxu1 %v2600_v0 }
 0x330   : > { %v697_v25 = vpop.f32.mrb[2].mxu1 }
 0x331   : > { %v701_v26 = vadd.f32 %v697_v25, %v396_v24  ;;  %v1842_v27 = vpop.f32.mrb[3].mxu1 }
 0x333   : > { %2391 = vtanh.f32 %v701_v26 }
 0x33d   : > { %v2392_v30 = vpop.eup %2391 }
 0x33e   : > { %v3095_v31 = vadd.f32 %v2392_v30, %v3012_v52  ;;  %1876 = vmatmul.mubr.f32.vlgmr.msra.gmra.mrb[10].mxu0 %v2392_v30 }
 0x33f   : > { %2216 = vmatpush3.bf16.msra.mxu0 %v2882_v9  ;;  %1945 = vmatprep.mubr.msk.f32.mxu0 %vm2601_vm0, %v2602_v1 }
 0x340   : > { %1185 = vst [vmem:[#allocation10 + $0x10] sm:$0xff] %v3095_v31  ;;  %2217 = vmatprep.subr.bf16.mxu0 %v2600_v0 }
 0x343   : > { %2219 = vmatpush3.bf16.msra.mxu0 %v2893_v15 }
 0x344   : > { %2220 = vmatprep.subr.bf16.mxu0 %v2600_v0 }
 0x347   : > { %2222 = vmatpush3.bf16.msra.mxu0 %v2905_v21 }
 0x348   : > { %2223 = vmatprep.subr.bf16.mxu0 %v2600_v0 }
 0x34b   : > { %2225 = vmatpush3.bf16.msra.mxu0 %v2920_v28 }
 0x34c   : > { %2226 = vmatprep.subr.bf16.mxu0 %v2600_v0 }
 0x34f   : > { %2228 = vmatpush3.bf16.msra.mxu0 %v2932_v34 }
 0x350   : > { %2229 = vmatprep.subr.bf16.mxu0 %v2600_v0 }
 0x353   : > { %2231 = vmatpush3.bf16.msra.mxu0 %v2944_v40 }
 0x354   : > { %2232 = vmatprep.subr.bf16.mxu0 %v2600_v0 }
 0x357   : > { %2234 = vmatpush3.bf16.msra.mxu0 %v2956_v46 }
 0x358   : > { %2235 = vmatprep.subr.bf16.mxu0 %v2600_v0 }
 0x35b   : > { %2237 = vmatpush3.bf16.msra.mxu0 %v2966_v50 }
 0x35c   : > { %2262 = vmatprep.subr.bf16.mxu0 %v2600_v0 }
 0x411   : > { %v788_v33 = vpop.f32.mrb[10].mxu0 }
 0x412   : > { %v792_v36 = vadd.f32 %v788_v33, %v401_v32  ;;  %v1877_v37 = vpop.f32.mrb[11].mxu0 }
 0x414   : > { %2393 = vtanh.f32 %v792_v36 }
 0x41e   : > { %v2394_v38 = vpop.eup %2393 }
 0x41f   : > { %v3118_v39 = vadd.f32 %v2394_v38, %v3015_v53  ;;  %1911 = vmatmul.mubr.f32.vlgmr.msra.gmra.mrb[4].mxu1 %v2394_v38 }
 0x420   : > { %2240 = vmatpush3.bf16.msra.mxu1 %v2882_v9  ;;  %1980 = vmatprep.mubr.msk.f32.mxu1 %vm2601_vm0, %v2602_v1 }
 0x421   : > { %1186 = vst [vmem:[#allocation10 + $0x18] sm:$0xff] %v3118_v39  ;;  %2241 = vmatprep.subr.bf16.mxu1 %v2600_v0 }
 0x424   : > { %2243 = vmatpush3.bf16.msra.mxu1 %v2893_v15 }
 0x425   : > { %2244 = vmatprep.subr.bf16.mxu1 %v2600_v0 }
 0x428   : > { %2246 = vmatpush3.bf16.msra.mxu1 %v2905_v21 }
 0x429   : > { %2247 = vmatprep.subr.bf16.mxu1 %v2600_v0 }
 0x42c   : > { %2249 = vmatpush3.bf16.msra.mxu1 %v2920_v28 }
 0x42d   : > { %2250 = vmatprep.subr.bf16.mxu1 %v2600_v0 }
 0x430   : > { %2252 = vmatpush3.bf16.msra.mxu1 %v2932_v34 }
 0x431   : > { %2253 = vmatprep.subr.bf16.mxu1 %v2600_v0 }
 0x434   : > { %2255 = vmatpush3.bf16.msra.mxu1 %v2944_v40 }
 0x435   : > { %2256 = vmatprep.subr.bf16.mxu1 %v2600_v0 }
 0x438   : > { %2258 = vmatpush3.bf16.msra.mxu1 %v2956_v46 }
 0x439   : > { %2259 = vmatprep.subr.bf16.mxu1 %v2600_v0 }
 0x43c   : > { %2261 = vmatpush3.bf16.msra.mxu1 %v2966_v50 }
 0x43d   : > { %2287 = vmatprep.subr.bf16.mxu1 %v2877_v5 }
 0x4f2   : > { %v879_v43 = vpop.f32.mrb[4].mxu1 }
 0x4f3   : > { %v883_v44 = vadd.f32 %v879_v43, %v406_v42  ;;  %v1912_v45 = vpop.f32.mrb[5].mxu1 }
 0x4f5   : > { %2395 = vtanh.f32 %v883_v44 }
 0x4ff   : > { %v2396_v48 = vpop.eup %2395 }
 0x500   : > { %v1179_v49 = vadd.f32 %v2396_v48, %v3018_v54  ;;  %1946 = vmatmul.mubr.f32.vlgmr.msra.gmra.mrb[12].mxu0 %v2396_v48 }
 0x501   : > { %2264 = vmatpush3.bf16.msra.mxu0 %v2882_v9  ;;  %2015 = vmatprep.mubr.msk.f32.mxu0 %vm2601_vm0, %v2602_v1  ;;  %v411_v1 = vadd.f32 %v3062_v8, %v3037_v58 }
 0x502   : > { %1187 = vst [vmem:[#allocation10 + $0x20] sm:$0xff] %v1179_v49  ;;  %2265 = vmatprep.subr.bf16.mxu0 %v2600_v0 }
 0x505   : > { %2267 = vmatpush3.bf16.msra.mxu0 %v2893_v15 }
 0x506   : > { %2268 = vmatprep.subr.bf16.mxu0 %v2600_v0 }
 0x509   : > { %2270 = vmatpush3.bf16.msra.mxu0 %v2905_v21 }
 0x50a   : > { %2271 = vmatprep.subr.bf16.mxu0 %v2600_v0 }
 0x50d   : > { %2273 = vmatpush3.bf16.msra.mxu0 %v2920_v28 }
 0x50e   : > { %2274 = vmatprep.subr.bf16.mxu0 %v2600_v0 }
 0x511   : > { %2276 = vmatpush3.bf16.msra.mxu0 %v2932_v34 }
 0x512   : > { %2277 = vmatprep.subr.bf16.mxu0 %v2600_v0 }
 0x515   : > { %2279 = vmatpush3.bf16.msra.mxu0 %v2944_v40 }
 0x516   : > { %2280 = vmatprep.subr.bf16.mxu0 %v2600_v0 }
 0x519   : > { %2282 = vmatpush3.bf16.msra.mxu0 %v2956_v46 }
 0x51a   : > { %2283 = vmatprep.subr.bf16.mxu0 %v2600_v0  ;;  %v416_v0 = vadd.f32 %v3037_v58, %v3068_v13 }
 0x51d   : > { %2285 = vmatpush3.bf16.msra.mxu0 %v2966_v50 }
 0x5d3   : > { %v970_v9 = vpop.f32.mrb[12].mxu0 }
 0x5d4   : > { %v974_v15 = vadd.f32 %v970_v9, %v411_v1  ;;  %v1947_v21 = vpop.f32.mrb[13].mxu0 }
 0x5d6   : > { %2397 = vtanh.f32 %v974_v15 }
 0x5e0   : > { %v2398_v28 = vpop.eup %2397 }
 0x5e1   : > { %v1180_v34 = vadd.f32 %v2398_v28, %v3021_v55  ;;  %1981 = vmatmul.mubr.f32.vlgmr.msra.gmra.mrb[6].mxu1 %v2398_v28 }
 0x5e2   : > { %2289 = vmatpush3.bf16.msra.mxu1 %v2877_v5  ;;  %2050 = vmatprep.mubr.f32.mxu1 %v3041_v4 }
 0x5e3   : > { %1188 = vst [vmem:[#allocation10 + $0x28] sm:$0xff] %v1180_v34  ;;  %2291 = vmatprep.subr.bf16.mxu1 %v2884_v10 }
 0x5e6   : > { %2293 = vmatpush3.bf16.msra.mxu1 %v2884_v10 }
 0x5e7   : > { %2295 = vmatprep.subr.bf16.mxu1 %v2897_v16 }
 0x5ea   : > { %2297 = vmatpush3.bf16.msra.mxu1 %v2897_v16 }
 0x5eb   : > { %2299 = vmatprep.subr.bf16.mxu1 %v2909_v22 }
 0x5ee   : > { %2301 = vmatpush3.bf16.msra.mxu1 %v2909_v22 }
 0x5ef   : > { %2303 = vmatprep.subr.bf16.mxu1 %v2924_v29 }
 0x5f2   : > { %2305 = vmatpush3.bf16.msra.mxu1 %v2924_v29 }
 0x5f3   : > { %2307 = vmatprep.subr.bf16.mxu1 %v2936_v35 }
 0x5f6   : > { %2309 = vmatpush3.bf16.msra.mxu1 %v2936_v35 }
 0x5f7   : > { %2311 = vmatprep.subr.bf16.mxu1 %v2948_v41 }
 0x5fa   : > { %2313 = vmatpush3.bf16.msra.mxu1 %v2948_v41 }
 0x5fb   : > { %2315 = vmatprep.subr.bf16.mxu1 %v2960_v47 }
 0x5fe   : > { %2317 = vmatpush3.bf16.msra.mxu1 %v2960_v47 }
 0x601   : > { %2051 = vmatmul.mubr.f32.vlgmr.msra.gmra.mrb[8].mxu1 %v3072_v23 }
 0x602   : > { %2053 = vmatprep.mubr.f32.mxu1 %v3095_v31 }
 0x605   : > { %2054 = vmatmul.mubr.f32.gmra.mrb[10].mxu1 %v3118_v39 }
 0x606   : > { %2056 = vmatprep.mubr.f32.mxu1 %v1179_v49 }
 0x609   : > { %2057 = vmatmul.mubr.f32.gmra.mrb[12].mxu1 %v1180_v34 }
 0x6b4   : > { %v1061_v5 = vpop.f32.mrb[6].mxu1 }
 0x6b5   : > { %v1065_v10 = vadd.f32 %v1061_v5, %v416_v0  ;;  %v1982_v16 = vpop.f32.mrb[7].mxu1 }
 0x6b7   : > { %2399 = vtanh.f32 %v1065_v10 }
 0x6c1   : > { %v2400_v22 = vpop.eup %2399 }
 0x6c2   : > { %v1181_v29 = vadd.f32 %v2400_v22, %v3024_v56  ;;  %2016 = vmatmul.mubr.f32.vlgmr.msra.gmra.mrb[14].mxu0 %v2400_v22 }
 0x6c4   : > { %1189 = vst [vmem:[#allocation10 + $0x30] sm:$0xff] %v1181_v29  ;;  %2059 = vmatprep.mubr.f32.mxu1 %v1181_v29 }
 0x6d4   : > { %v2052_v35 = vpop.f32.mrb[8].mxu1 }
 0x6d5   : > { %v1288_v40 = vpop.f32.mrb[9].mxu1 }
 0x6d8   : > { %v2055_v41 = vpop.f32.mrb[10].mxu1 }
 0x6d9   : > { %v1298_v46 = vpop.f32.mrb[11].mxu1 }
 0x6dc   : > { %v2058_v47 = vpop.f32.mrb[12].mxu1 }
 0x6dd   : > { %v1308_v50 = vpop.f32.mrb[13].mxu1 }
 0x795   : > { %v1152_v52 = vpop.f32.mrb[14].mxu0 }
 0x796   : > { %v1156_v53 = vadd.f32 %v1152_v52, %v421_v51  ;;  %v2017_v54 = vpop.f32.mrb[15].mxu0 }
 0x798   : > { %2401 = vtanh.f32 %v1156_v53 }
 0x7a2   : > { %v2402_v55 = vpop.eup %2401 }
 0x7a3   : > { %v1182_v56 = vadd.f32 %v2402_v55, %v3027_v57  ;;  %1336 = vst [vmem:[%s2865_s17] sm:$0xff] %v2402_v55 }
 0x7a5   : > { %1190 = vst [vmem:[#allocation10 + $0x38] sm:$0xff] %v1182_v56  ;;  %2060 = vmatmul.mubr.f32.gmra.mrb[14].mxu1 %v1182_v56 }
 0x7a6   : > { %2502 = shalt.err (!%p2499_p12)
}
 0x7a7   : > { %s2503_s14 = scalar_lea.hbm %s3263_s4, 1024  ;;  %p3287_p0 = pmov %p3286_p8 }
 0x7a8   : > { %p2504_p3 = scmp.ne.s32.totalorder %s3263_s4, %s2503_s14  ;;  %p2509_p7 = scmp.lt.u32.totalorder %s2503_s14, %s3263_s4 }
 0x7aa   : > { %p2505_p2 = pnand %p2504_p3, %p3287_p0 }
 0x7ac   : > { %p2506_p5 = pneg %p2505_p2 }
 0x7ae   : > { %p2511_p13 = pnand %p2509_p7, %p2506_p5 }
 0x7b0   : > { %2514 = shalt.err (!%p2511_p13)
}
 0x7b1   : > { %s2603_s25 = smov 128   ;;  %s2604_s1 = smov 8  }
 0x7b2   : > { %p3288_p6 = pmov %p3287_p0  ;;  %s3217_s9 = scalar_lea.hbm %s3264_s5, %s1503_s28 }
 0x7b3   : > { %s1338_s29 = scalar_lea.sflag [#allocation12], %s2800_s10  ;;  %s2515_s14 = scalar_lea.vmem %s1365_s13, 128 }
 0x7b4   : > { %2326 = dma.vmem_to_hbm [thread:$0]  (%p3288_p6), %s2826_s16, 1024, %s3263_s4, [#allocation7], %s2603_s25, %s2603_s25, %s2604_s1  }
 0x7b5   : > { %p2516_p1 = scmp.ne.s32.totalorder %s1365_s13, %s2515_s14  ;;  %p3289_p11 = scmp.ne.s32.totalorder %s3273_s30, 0 }
 0x7b6   : > { %s2605_s8 = smov [#allocation11]  }
 0x7b7   : > { %p2517_p10 = pnand %p2516_p1, %p3289_p11  ;;  %s2519_s11 = sshll.u32 %s2605_s8, 4  ;;  %s2520_s11 = int_to_ptr.vmem [resolvable:$false] %s2519_s11 }
 0x7b8   : > { %s2521_s7 = scalar_lea.vmem %s2520_s11, 256  ;;  %p2522_p9 = scmp.lt.s32.totalorder %s1365_s13, %s2520_s11 }
 0x7b9   : > { %p2518_p8 = pneg %p2517_p10  ;;  %p2523_p4 = scmp.lt.s32.totalorder %s2521_s7, %s2515_s14 }
 0x7bb   : > { %p2524_p12 = por %p2523_p4, %p2522_p9 }
 0x7bd   : > { %p2525_p3 = pnand %p2524_p12, %p2518_p8 }
 0x7bf   : > { %2528 = shalt.err (!%p2525_p3)
}
 0x7c0   : > { %s2529_s10 = scalar_lea.hbm %s3217_s9, 128  ;;  %s2533_s12 = scalar_lea.hbm %s3264_s5, 256 }
 0x7c1   : > { %p2530_p0 = scmp.ne.s32.totalorder %s3217_s9, %s2529_s10  ;;  %p2534_p7 = scmp.lt.u32.totalorder %s3217_s9, %s3264_s5 }
 0x7c2   : > { %p2535_p13 = scmp.lt.u32.totalorder %s2533_s12, %s2529_s10  ;;  %p2537_p1 = scmp.lt.u32.totalorder %s2529_s10, %s3217_s9 }
 0x7c3   : > { %p2531_p2 = pnand %p2530_p0, %p3289_p11 }
 0x7c4   : > { %p2536_p6 = por %p2535_p13, %p2534_p7 }
 0x7c5   : > { %p2532_p5 = pneg %p2531_p2 }
 0x7c6   : > { %p2538_p10 = por %p2537_p1, %p2536_p6 }
 0x7c8   : > { %p2539_p8 = pnand %p2538_p10, %p2532_p5 }
 0x7ca   : > { %2542 = shalt.err (!%p2539_p8)
}
 0x7cb   : > { %2327 = dma.vmem_to_hbm [thread:$0]  (%p3289_p11), %s1365_s13, 128, %s3217_s9, %s1338_s29  }
 0x7cc   : > { %p3290_p9 = scmp.eq.s32.totalorder %s2657_s22, 1 }
 0x878   : > { %v2061_v57 = vpop.f32.mrb[14].mxu1 }
 0x879   : > { %v1318_v58 = vpop.f32.mrb[15].mxu1 }
 0x87a   : > { %2572 = dma.done.wait (%p3290_p9), [#allocation7], 1024   ;;  %p3291_p4 = pmov %p3290_p9 }
 0x87c   : > { %2574 = vsyncadd (%p3291_p4), [#allocation7], 4294966272 }
 0x87d PF: > { %s1380_s23 = sand.u32 1, %s2581_s18   ;;  %p3292_p12 = scmp.ne.s32.totalorder %s3274_s6, 0 }
 0x87e   : > { %p3293_p3 = scmp.ge.s32.totalorder %s2593_s21, 2  ;;  %s1381_s17 = scalar_lea.sflag [#allocation12], %s1380_s23 }
 0x880   : > { %p2339_p0 = pnand %p3293_p3, %p3292_p12 }
 0x882   : > { %2576 = dma.done.wait (!%p2339_p0), %s1381_s17, 128  }
 0x883   : > { %2578 = vsyncadd (!%p2339_p0), %s1381_s17, 4294967168  ;;  %p23_p11 = scmp.ge.s32.totalorder %s2661_s24, 4   ;;  %s3294_s18 = smov %s2585_s19 }
 0x884   : > { %s3295_s19 = smov %s2589_s20  ;;  %s3296_s20 = smov %s2673_s27 }
 0x885   : > { %s3297_s21 = smov %s2661_s24  ;;  %25 = sbr.rel (!%p23_p11) target bundleno = 10 (0xa), region = 118 }
 0x88c   :  { %1386 = vsyncpa [#allocation6], 1 }
 0x88d   :  { %1388 = vsyncpa [#allocation6 + $0x1], 1 }
 0x88e   :  { %1389 = vsyncpa [#allocation9], 1 }
 0x88f   :  { %1391 = vsyncpa [#allocation9 + $0x1], 1 }
 0x890   :  { %1392 = vsyncpa [#allocation7], 1 }
 0x891   :  { %1394 = vsyncpa [#allocation7 + $0x1], 1 }
 0x892   :  { %1395 = vsyncpa [#allocation12], 1 }
 0x893   :  { %1397 = vsyncpa [#allocation12 + $0x1], 1 }
 0x894   :  { %1398 = vsyncmov [#allocation4] }
 0x897   :  { %s1399_s21 = vpop.sfrf %1398 }
 0x898   :  { %p1507_p2 = scmp.ne.s32.totalorder %s1399_s21, 0 }
 0x89a   :  { %1403 = shalt.err (%p1507_p2)  }

</bundles_post_ra>
